<compile_context>
chip_gen: v7x
topology: tpu7x:2x2x1
jax: 0.10.0
libtpu: 0.0.40
codegen_flags: <defaults>
</compile_context>

<pallas_src>
import jax
import jax.numpy as jnp
from jax.experimental import pallas as pl
from jax.experimental.pallas import tpu as pltpu

_TARGET_STEPS = 8          # aim for >= 8 pipelined grid steps
_LANE_CANDIDATES = (512, 384, 256, 128)


def _round_up(a, b):
    return (a + b - 1) // b * b


def _max_block_rows():
    """Generation-aware max rows per block (lanes=512, f32 -> 2 or 4 MiB)."""
    try:
        kind = jax.devices()[0].device_kind.lower()
    except Exception:
        return 1024
    # v5e's scoped-VMEM default is 16 MiB -> keep 2 MiB blocks there.
    if "v5" in kind or "v4" in kind:
        return 1024
    # v6e / v7x: 4 MiB blocks (~16 MiB double-buffered in+out) fit the 32 MiB default.
    return 2048


def _pick_lanes(total):
    """Largest multiple of 128 dividing `total` (no pad); else 128 (minimal pad)."""
    for lanes in _LANE_CANDIDATES:
        if total % lanes == 0:
            return lanes, False
    return 128, True


def _film_kernel(gb_ref, x_ref, o_ref):
    """o = gamma * x + beta, gamma/beta scalars read from SMEM."""
    gamma = gb_ref[0]
    beta = gb_ref[1]
    # f32 math matches PyTorch's promotion (float32 scalar * x); cast on store.
    o_ref[...] = (gamma * x_ref[...] + beta).astype(o_ref.dtype)


def scalar_film(x, cond, params):
    """x: float array of any shape. cond: float (cond_dim,).
       params: dict of (in, out) weights and (1, out) biases (Linear weight.T)."""
    # TODO(synk): integer x would silently truncate gamma*x+beta on the cast
    # back to x.dtype; PyTorch would promote to float. Guard against it here.
    assert jnp.issubdtype(x.dtype, jnp.floating), "ScalarFiLM expects float x"

    w1, b1, w2, b2, w3, b3 = (params["w1"], params["b1"], params["w2"],
                              params["b2"], params["w3"], params["b3"])

    # --- 1) conditioning MLP: tiny, leave it to XLA (fuses into one fusion) --
    c = cond.reshape(1, -1).astype(jnp.float32)
    h = jax.nn.gelu(jnp.dot(c, w1) + b1, approximate=False)   # exact GELU == nn.GELU()
    h = jax.nn.gelu(jnp.dot(h, w2) + b2, approximate=False)
    gb = (jnp.dot(h, w3) + b3).reshape(2)                      # (2,) f32 [gamma, beta]

    # --- 2) FiLM modulation over a lane-dense slab of x ----------------------
    orig_shape = x.shape
    total = x.size
    itemsize = jnp.dtype(x.dtype).itemsize
    sublane = max(8, 32 // max(itemsize, 1))        # 8 f32 / 16 bf16 / 32 int8

    lanes, needs_pad = _pick_lanes(total)
    x_flat = x.reshape(-1)
    if needs_pad:
        padded_total = _round_up(total, lanes)
        x_flat = jnp.pad(x_flat, (0, padded_total - total))
    else:
        padded_total = total
    rows = padded_total // lanes
    x2d = x_flat.reshape(rows, lanes)

    max_rows = _max_block_rows()
    if rows <= sublane:
        block_rows = rows                            # block == full array dim (allowed)
    else:
        block_rows = _round_up(pl.cdiv(rows, _TARGET_STEPS), sublane)
        block_rows = min(block_rows, _round_up(max_rows, sublane))
        block_rows = min(block_rows, _round_up(rows, sublane))
    grid = (pl.cdiv(rows, block_rows),)              # ragged last block handled by Pallas

    cost = pl.CostEstimate(
        flops=2 * total,
        transcendentals=0,
        bytes_accessed=2 * total * itemsize,
    )

    out2d = pl.pallas_call(
        _film_kernel,
        out_shape=jax.ShapeDtypeStruct((rows, lanes), x.dtype),
        grid=grid,
        in_specs=[
            pl.BlockSpec(memory_space=pltpu.MemorySpace.SMEM),     # (2,) gamma/beta
            pl.BlockSpec((block_rows, lanes), lambda i: (i, 0)),   # x tile
        ],
        out_specs=pl.BlockSpec((block_rows, lanes), lambda i: (i, 0)),
        compiler_params=pltpu.CompilerParams(
            dimension_semantics=("parallel",),       # shards rows across v7x's 2 TCs
            vmem_limit_bytes=32 * 1024 * 1024,
        ),
        cost_estimate=cost,
    )(gb, x2d)

    out_flat = out2d.reshape(-1)
    if needs_pad:
        out_flat = out_flat[:total]
    return out_flat.reshape(orig_shape)


def init_params(key, cond_dim, film_hidden_dims):
    h0, h1 = film_hidden_dims
    ks = jax.random.split(key, 6)
    # weights stored as (in, out); equivalent to PyTorch Linear weight.T
    w1 = jax.random.normal(ks[0], (cond_dim, h0), jnp.float32) * 0.2
    b1 = jax.random.normal(ks[1], (1, h0), jnp.float32) * 0.1
    w2 = jax.random.normal(ks[2], (h0, h1), jnp.float32) * 0.2
    b2 = jax.random.normal(ks[3], (1, h1), jnp.float32) * 0.1
    w3 = jax.random.normal(ks[4], (h1, 2), jnp.float32) * 0.2
    b3 = jax.random.normal(ks[5], (1, 2), jnp.float32) * 0.1
    return dict(w1=w1, b1=b1, w2=w2, b2=b2, w3=w3, b3=b3)


def reference(x, cond, p):
    h = jax.nn.gelu(cond.reshape(1, -1) @ p["w1"] + p["b1"], approximate=False)
    h = jax.nn.gelu(h @ p["w2"] + p["b2"], approximate=False)
    gb = (h @ p["w3"] + p["b3"])[0]
    return gb[0] * x + gb[1]


if __name__ == "__main__":
    key = jax.random.PRNGKey(0)
    k_x, k_c, k_p = jax.random.split(key, 3)

    cond_dim = 8
    film_hidden_dims = (32, 32)
    # x: NCHW, batch=2, channels=4, spatial=16 -> 2048 elems (no-pad, lanes=512)
    x = jax.random.normal(k_x, (2, 4, 16, 16), jnp.float32)
    cond = jax.random.normal(k_c, (cond_dim,), jnp.float32)
    params = init_params(k_p, cond_dim, film_hidden_dims)

    film = jax.jit(scalar_film)

    out = jax.block_until_ready(film(x, cond, params))
    ref = reference(x, cond, params)
    assert out.shape == x.shape and out.dtype == x.dtype
    assert jnp.allclose(out, ref, atol=1e-5, rtol=1e-5)

    # Exercise the padded / ragged path (size 105, not a multiple of 128).
    x2 = jax.random.normal(k_x, (3, 5, 7), jnp.float32)
    out2 = jax.block_until_ready(film(x2, cond, params))
    assert jnp.allclose(out2, reference(x2, cond, params), atol=1e-5, rtol=1e-5)

    # Exercise bf16 storage (f32 math inside, cast on store).
    xb = x.astype(jnp.bfloat16)
    outb = jax.block_until_ready(film(xb, cond, params))
    assert outb.dtype == jnp.bfloat16 and outb.shape == xb.shape
    assert jnp.allclose(outb.astype(jnp.float32),
                        reference(xb.astype(jnp.float32), cond, params),
                        atol=3e-2, rtol=3e-2)

    print("KERNEL_OK")
</pallas_src>

<mosaic_0001>
module attributes {stable_mosaic.version = 11 : i64} {
  func.func @_film_kernel(%arg0: i32, %arg1: memref<2xf32, #tpu.memory_space<smem>>, %arg2: memref<4x512xf32, #tpu.memory_space<vmem>>, %arg3: memref<4x512xf32, #tpu.memory_space<vmem>>) attributes {dimension_semantics = [#tpu.dimension_semantics<parallel>], iteration_bounds = array<i64: 1>, scalar_prefetch = 0 : i64, scratch_operands = 0 : i64, tpu.core_type = #tpu.core_type<tc>, window_params = [{transform_indices = @transform_0, window_bounds = array<i64: 2>}, {transform_indices = @transform_1, window_bounds = array<i64: 4, 512>}, {transform_indices = @transform_2, window_bounds = array<i64: 4, 512>}]} {
    %c0 = arith.constant 0 : index
    %0 = memref.load %arg1[%c0] : memref<2xf32, #tpu.memory_space<smem>>
    %c1 = arith.constant 1 : index
    %1 = memref.load %arg1[%c1] : memref<2xf32, #tpu.memory_space<smem>>
    %c0_0 = arith.constant 0 : index
    %c0_1 = arith.constant 0 : index
    %2 = vector.load %arg2[%c0_0, %c0_1] : memref<4x512xf32, #tpu.memory_space<vmem>>, vector<4x512xf32>
    %3 = vector.broadcast %0 : f32 to vector<4x512xf32>
    %4 = arith.mulf %3, %2 : vector<4x512xf32>
    %5 = vector.broadcast %1 : f32 to vector<4x512xf32>
    %6 = arith.addf %4, %5 : vector<4x512xf32>
    %c0_2 = arith.constant 0 : index
    %c0_3 = arith.constant 0 : index
    %7 = vector.load %arg3[%c0_2, %c0_3] : memref<4x512xf32, #tpu.memory_space<vmem>>, vector<4x512xf32>
    tpu.vector_store %arg3[%c0_2, %c0_3], %6 {strides = array<i32>} : memref<4x512xf32, #tpu.memory_space<vmem>>, vector<4x512xf32>,
    return
  }
  func.func @transform_0(%arg0: i32) -> i32 {
    %c0_i32 = arith.constant 0 : i32
    %c0_i32_0 = arith.constant 0 : i32
    return %c0_i32 : i32
  }
  func.func @transform_1(%arg0: i32) -> (i32, i32) {
    %c0_i32 = arith.constant 0 : i32
    %c0_i32_0 = arith.constant 0 : i32
    return %arg0, %c0_i32 : i32, i32
  }
  func.func @transform_2(%arg0: i32) -> (i32, i32) {
    %c0_i32 = arith.constant 0 : i32
    %c0_i32_0 = arith.constant 0 : i32
    return %arg0, %c0_i32 : i32, i32
  }
}

</mosaic_0001>

<bundles_post_ra>
// kernel: scalar_film.1
= control target key start
LH: loop header
LB: loop body
LE: loop exit
PB: predicated region body
PF: predicated region fallthrough
CT: control target
= control target key end

     0   :  { %7 = vsyncpa [#allocation3], 0  ;;  %s88_s0 = inlined_call_operand.vmem [shape: f32[2], index: 0, kind: input, shape index: {}]   ;;  %s89_s1 = inlined_call_operand.vmem [shape: f32[4,512], index: 1, kind: input, shape index: {}]   ;;  %s90_s2 = inlined_call_operand.vmem [shape: f32[4,512], index: 2, kind: output, shape index: {}]  }
   0x1   :  { %s14_s11 = sshll.u32 %s88_s0, 4  ;;  %s15_s11 = int_to_ptr.vmem [resolvable:$true] %s14_s11 }
   0x2   :  { %s43_s12 = scalar_lea.vmem %s15_s11, 16  ;;  %p48_p1 = scmp.lt.s32.totalorder %s15_s11, %s15_s11 }
   0x3   :  { %p44_p0 = scmp.ne.s32.totalorder %s15_s11, %s43_s12  ;;  %p49_p2 = scmp.lt.s32.totalorder %s43_s12, %s43_s12 }
   0x5   :  { %p50_p3 = por %p49_p2, %p48_p1 }
   0x7   :  { %p51_p4 = pnand %p50_p3, %p44_p0 }
   0x9   :  { %54 = shalt.err (!%p51_p4)
}
   0xa   :  { %s57_s13 = smov [#allocation2]  }
   0xb   :  { %17 = dma.vmem_to_smem %s15_s11, 16, %s57_s13, [#allocation3]  }
   0xc   :  { %55 = dma.done.wait [#allocation3], 16  }
   0xd   :  { %56 = vsyncadd [#allocation3], 4294967280 }
   0xe   :  { %23 = sfence }
   0xf   :  { %s24_s14 = sld [smem:[#allocation2]]  ;;  %s41_s15 = sld [smem:[#allocation2 + $0x1]]  ;;  %v26_v0 = vld [vmem:[%s89_s1] sm:$0xff]  ;;  %v27_v1 = vld [vmem:[%s89_s1 + $0x8] sm:$0xff] }
  0x15   :  { %v28_v2 = vstv %s24_s14  ;;  %v31_v3 = vstv %s41_s15 }
  0x16   :  { %v29_v4 = vmul.f32 %v28_v2, %v26_v0  ;;  %v30_v5 = vmul.f32 %v28_v2, %v27_v1 }
  0x18   :  { %v32_v6 = vadd.f32 %v31_v3, %v29_v4  ;;  %v33_v7 = vadd.f32 %v31_v3, %v30_v5 }
  0x1a   :  { %34 = vst [vmem:[%s90_s2] sm:$0xff] %v32_v6  ;;  %35 = vst [vmem:[%s90_s2 + $0x8] sm:$0xff] %v33_v7 }
  0x1b   :  { %40 = vsyncpa [#allocation3], 1 }

</bundles_post_ra>
